<compile_context>
chip_gen: v6e
topology: v6e:2x2x1
jax: 0.10.0
libtpu: 0.0.40
codegen_flags: <defaults>
</compile_context>

<pallas_src>
import functools
import math

import jax
import jax.numpy as jnp
from jax.experimental import pallas as pl
from jax.experimental.pallas import tpu as pltpu

EPS = 1e-5
_LANE = 128


def _vmem_capacity_bytes():
    """Per-core VMEM capacity; conservative fallback if the query fails."""
    try:
        cap = getattr(pltpu.get_tpu_info(), "vmem_capacity_bytes", None)
        if cap:
            return int(cap)
    except Exception:
        pass
    return 64 * 1024 * 1024  # v7x per-TC VMEM; a safe lower bound on every chip


# ------------------------------ kernel bodies ------------------------------
# Simple path: the kernel block's last dim is the full hidden dim H.

def _ln_bias_kernel(x_ref, w_ref, b_ref, o_ref):
    # x_ref: (tile_rows, H); w_ref/b_ref: (1, H). Stats in f32, stable 2-pass.
    x = x_ref[...].astype(jnp.float32)
    mean = jnp.mean(x, axis=-1, keepdims=True)
    xc = x - mean
    var = jnp.mean(xc * xc, axis=-1, keepdims=True)
    inv = jax.lax.rsqrt(var + EPS)
    y = xc * inv * w_ref[...].astype(jnp.float32) + b_ref[...].astype(jnp.float32)
    o_ref[...] = y.astype(o_ref.dtype)


def _ln_nobias_kernel(x_ref, w_ref, o_ref):
    x = x_ref[...].astype(jnp.float32)
    mean = jnp.mean(x, axis=-1, keepdims=True)
    xc = x - mean
    var = jnp.mean(xc * xc, axis=-1, keepdims=True)
    inv = jax.lax.rsqrt(var + EPS)
    y = xc * inv * w_ref[...].astype(jnp.float32)
    o_ref[...] = y.astype(o_ref.dtype)


# Packed path: fold = 128 // H logical rows share one 128-lane physical row.
# m_ref:  (fold*H, fold) block-diagonal ones -> per-row (segment) sums.
# mt_ref: (fold, fold*H) its transpose        -> broadcast back to lanes.
# (mt passed explicitly so no in-kernel transpose / transposed dot_general.)

def _ln_packed_bias_kernel(x_ref, w_ref, b_ref, m_ref, mt_ref, o_ref, *, inv_h):
    x = x_ref[...].astype(jnp.float32)                                  # (tr, 128)
    m = m_ref[...]
    mt = mt_ref[...]
    seg = jnp.dot(x, m, preferred_element_type=jnp.float32)             # (tr, fold)
    mean = jnp.dot(seg, mt, preferred_element_type=jnp.float32) * inv_h  # (tr, 128)
    xc = x - mean
    segv = jnp.dot(xc * xc, m, preferred_element_type=jnp.float32)
    var = jnp.dot(segv, mt, preferred_element_type=jnp.float32) * inv_h
    inv = jax.lax.rsqrt(var + EPS)
    y = xc * inv * w_ref[...].astype(jnp.float32) + b_ref[...].astype(jnp.float32)
    o_ref[...] = y.astype(o_ref.dtype)


def _ln_packed_nobias_kernel(x_ref, w_ref, m_ref, mt_ref, o_ref, *, inv_h):
    x = x_ref[...].astype(jnp.float32)
    m = m_ref[...]
    mt = mt_ref[...]
    seg = jnp.dot(x, m, preferred_element_type=jnp.float32)
    mean = jnp.dot(seg, mt, preferred_element_type=jnp.float32) * inv_h
    xc = x - mean
    segv = jnp.dot(xc * xc, m, preferred_element_type=jnp.float32)
    var = jnp.dot(segv, mt, preferred_element_type=jnp.float32) * inv_h
    inv = jax.lax.rsqrt(var + EPS)
    y = xc * inv * w_ref[...].astype(jnp.float32)
    o_ref[...] = y.astype(o_ref.dtype)


# ------------------------------- tile sizing -------------------------------

def _choose_tile_rows(rows, width, in_itemsize, out_itemsize, tile_budget,
                      requested=None):
    """Largest multiple-of-8 row tile whose working set fits `tile_budget`.

    Counts double-buffered in/out tiles AND the in-kernel f32 temporaries
    (x upcast, xc, y ~ 3 * tr * width * 4 bytes) so the auto-pick never
    exceeds real VMEM (important for bf16 inputs with large H on v7x).
    """
    per_row = 2 * width * (in_itemsize + out_itemsize) + 3 * width * 4
    max_by_vmem = max(8, (tile_budget // max(per_row, 1)) // 8 * 8)
    tile = requested if requested is not None else 1024
    tile = min(tile, max_by_vmem)
    rows_up = ((rows + 7) // 8) * 8
    tile = min(tile, rows_up)
    # Guarantee >=2 grid steps whenever rows allow it, so the single
    # "parallel" grid axis can be sharded across both TensorCores on v7x.
    if rows_up >= 16 and tile >= rows_up:
        tile = ((rows_up // 2 + 7) // 8) * 8
    return max(8, (tile // 8) * 8)


# --------------------------------- wrapper ---------------------------------

def layer_norm(x, weight, bias=None, *, tile_rows=None):
    """LayerNorm over the last axis of x. x: (..., H). weight/bias: (H,)."""
    orig_shape = x.shape
    H = orig_shape[-1]
    rows = math.prod(orig_shape[:-1]) if len(orig_shape) > 1 else 1
    x2 = x.reshape(rows, H)
    out_dtype = x.dtype
    in_item = x2.dtype.itemsize
    out_item = jnp.dtype(out_dtype).itemsize

    vmem_cap = _vmem_capacity_bytes()
    tile_budget = vmem_cap // 2        # tiles + temporaries get half of VMEM
    vmem_limit_cap = (vmem_cap * 3) // 4  # never request all of physical VMEM

    # Lane-dense repack for small hidden dims (e.g. H=32): zero-copy reshape
    # so the kernel's last dim is exactly 128 lanes.
    fold = _LANE // H if (0 < H < _LANE and _LANE % H == 0) else 1
    packed = fold > 1 and rows % fold == 0
    if packed:
        prows = rows // fold
        width = fold * H  # == 128
        xk = x2.reshape(prows, width)                       # zero-copy
        w_row = jnp.tile(weight.reshape(-1), fold).reshape(1, width)
        b_row = None if bias is None else jnp.tile(bias.reshape(-1), fold).reshape(1, width)
        seg_m = (jnp.arange(width)[:, None] // H ==
                 jnp.arange(fold)[None, :]).astype(jnp.float32)       # (width, fold)
        seg_mt = seg_m.T                                               # (fold, width)
    else:
        # NOTE: if H is not a multiple of 128 this path uses masked partial
        # stores; acceptable fallback for odd shapes.
        prows, width = rows, H
        xk = x2
        w_row = weight.reshape(1, H)
        b_row = None if bias is None else bias.reshape(1, H)
        seg_m = seg_mt = None

    tr = _choose_tile_rows(prows, width, in_item, out_item, tile_budget, tile_rows)
    grid = (pl.cdiv(prows, tr),)

    # vmem_limit: double-buffered in/out tiles + f32 temporaries + params + headroom.
    tile_bytes = tr * width * (in_item + out_item)
    temps_bytes = 3 * tr * width * 4
    vmem_need = 2 * tile_bytes + temps_bytes + 8 * width * 4
    vmem_limit = int(min(max(vmem_need + (8 << 20), 16 << 20), vmem_limit_cap))

    x_spec = pl.BlockSpec((tr, width), lambda i: (i, 0))
    p_spec = pl.BlockSpec((1, width), lambda i: (0, 0))
    o_spec = pl.BlockSpec((tr, width), lambda i: (i, 0))

    compiler_params = pltpu.CompilerParams(
        dimension_semantics=("parallel",),
        vmem_limit_bytes=vmem_limit,
    )

    if packed:
        m_spec = pl.BlockSpec((width, fold), lambda i: (0, 0))
        mt_spec = pl.BlockSpec((fold, width), lambda i: (0, 0))
        if bias is None:
            kernel = functools.partial(_ln_packed_nobias_kernel, inv_h=1.0 / H)
            in_specs = [x_spec, p_spec, m_spec, mt_spec]
            args = (xk, w_row, seg_m, seg_mt)
        else:
            kernel = functools.partial(_ln_packed_bias_kernel, inv_h=1.0 / H)
            in_specs = [x_spec, p_spec, p_spec, m_spec, mt_spec]
            args = (xk, w_row, b_row, seg_m, seg_mt)
    else:
        if bias is None:
            kernel = _ln_nobias_kernel
            in_specs = [x_spec, p_spec]
            args = (xk, w_row)
        else:
            kernel = _ln_bias_kernel
            in_specs = [x_spec, p_spec, p_spec]
            args = (xk, w_row, b_row)

    out = pl.pallas_call(
        kernel,
        out_shape=jax.ShapeDtypeStruct((prows, width), out_dtype),
        grid_spec=pltpu.PrefetchScalarGridSpec(
            num_scalar_prefetch=0,
            grid=grid,
            in_specs=in_specs,
            out_specs=o_spec,
        ),
        compiler_params=compiler_params,
    )(*args)

    return out.reshape(orig_shape)


# -------------------------------- reference --------------------------------

def _reference(x, weight, bias):
    mean = jnp.mean(x, axis=-1, keepdims=True)
    var = jnp.mean((x - mean) ** 2, axis=-1, keepdims=True)
    y = (x - mean) * jax.lax.rsqrt(var + EPS) * weight
    if bias is not None:
        y = y + bias
    return y


if __name__ == "__main__":
    key = jax.random.PRNGKey(0)
    B, T, H = 2, 8, 32  # batch=2, seq=8, hidden=32
    x = jax.random.normal(key, (B, T, H), dtype=jnp.float32)

    # Deterministic params matching nn.Parameter(torch.ones / torch.zeros)
    weight = jnp.ones((H,), dtype=jnp.float32)
    bias = jnp.zeros((H,), dtype=jnp.float32)

    # bias=True case (lane-dense packed path: 128//32 = 4 rows per vreg row)
    y = layer_norm(x, weight, bias)
    y = jax.block_until_ready(y)
    ref = _reference(x, weight, bias)
    assert jnp.max(jnp.abs(y - ref)) < 1e-4, "mismatch vs reference (bias=True)"

    # bias=False case (dedicated kernel, no zero-bias DMA)
    y_nb = layer_norm(x, weight, None)
    y_nb = jax.block_until_ready(y_nb)
    ref_nb = _reference(x, weight, None)
    assert jnp.max(jnp.abs(y_nb - ref_nb)) < 1e-4, "mismatch vs reference (bias=False)"

    print("KERNEL_OK")
</pallas_src>

<mosaic_0001>
module attributes {stable_mosaic.version = 11 : i64} {
  func.func @_ln_packed_bias_kernel(%arg0: i32, %arg1: memref<8x128xf32, #tpu.memory_space<vmem>>, %arg2: memref<1x128xf32, #tpu.memory_space<vmem>>, %arg3: memref<1x128xf32, #tpu.memory_space<vmem>>, %arg4: memref<128x4xf32, #tpu.memory_space<vmem>>, %arg5: memref<4x128xf32, #tpu.memory_space<vmem>>, %arg6: memref<8x128xf32, #tpu.memory_space<vmem>>) attributes {dimension_semantics = [#tpu.dimension_semantics<parallel>], iteration_bounds = array<i64: 1>, scalar_prefetch = 0 : i64, scratch_operands = 0 : i64, tpu.core_type = #tpu.core_type<tc>, window_params = [{transform_indices = @transform_0, window_bounds = array<i64: 8, 128>}, {pipeline_mode = #tpu.pipeline_mode<synchronous>, transform_indices = @transform_1, window_bounds = array<i64: 1, 128>}, {pipeline_mode = #tpu.pipeline_mode<synchronous>, transform_indices = @transform_2, window_bounds = array<i64: 1, 128>}, {pipeline_mode = #tpu.pipeline_mode<synchronous>, transform_indices = @transform_3, window_bounds = array<i64: 128, 4>}, {pipeline_mode = #tpu.pipeline_mode<synchronous>, transform_indices = @transform_4, window_bounds = array<i64: 4, 128>}, {transform_indices = @transform_5, window_bounds = array<i64: 8, 128>}]} {
    %c0 = arith.constant 0 : index
    %c0_0 = arith.constant 0 : index
    %0 = vector.load %arg1[%c0, %c0_0] : memref<8x128xf32, #tpu.memory_space<vmem>>, vector<8x128xf32>
    %c0_1 = arith.constant 0 : index
    %c0_2 = arith.constant 0 : index
    %1 = vector.load %arg4[%c0_1, %c0_2] : memref<128x4xf32, #tpu.memory_space<vmem>>, vector<128x4xf32>
    %c0_3 = arith.constant 0 : index
    %c0_4 = arith.constant 0 : index
    %2 = vector.load %arg5[%c0_3, %c0_4] : memref<4x128xf32, #tpu.memory_space<vmem>>, vector<4x128xf32>
    %cst = arith.constant dense<0.000000e+00> : vector<8x4xf32>
    %3 = tpu.matmul %0, %1, %cst {dimension_numbers = #tpu.dot_dimension_numbers<[1], [0], [0], [1], [0, 0, 1, 1], [], []>} : vector<8x128xf32>, vector<128x4xf32>, vector<8x4xf32> -> vector<8x4xf32>
    %cst_5 = arith.constant dense<0.000000e+00> : vector<8x128xf32>
    %4 = tpu.matmul %3, %2, %cst_5 {dimension_numbers = #tpu.dot_dimension_numbers<[1], [0], [0], [1], [0, 0, 1, 1], [], []>} : vector<8x4xf32>, vector<4x128xf32>, vector<8x128xf32> -> vector<8x128xf32>
    %cst_6 = arith.constant 3.125000e-02 : f32
    %5 = vector.broadcast %cst_6 : f32 to vector<8x128xf32>
    %6 = arith.mulf %4, %5 : vector<8x128xf32>
    %7 = arith.subf %0, %6 : vector<8x128xf32>
    %8 = arith.mulf %7, %7 : vector<8x128xf32>
    %cst_7 = arith.constant dense<0.000000e+00> : vector<8x4xf32>
    %9 = tpu.matmul %8, %1, %cst_7 {dimension_numbers = #tpu.dot_dimension_numbers<[1], [0], [0], [1], [0, 0, 1, 1], [], []>} : vector<8x128xf32>, vector<128x4xf32>, vector<8x4xf32> -> vector<8x4xf32>
    %cst_8 = arith.constant dense<0.000000e+00> : vector<8x128xf32>
    %10 = tpu.matmul %9, %2, %cst_8 {dimension_numbers = #tpu.dot_dimension_numbers<[1], [0], [0], [1], [0, 0, 1, 1], [], []>} : vector<8x4xf32>, vector<4x128xf32>, vector<8x128xf32> -> vector<8x128xf32>
    %cst_9 = arith.constant 3.125000e-02 : f32
    %11 = vector.broadcast %cst_9 : f32 to vector<8x128xf32>
    %12 = arith.mulf %10, %11 : vector<8x128xf32>
    %cst_10 = arith.constant 9.99999974E-6 : f32
    %13 = vector.broadcast %cst_10 : f32 to vector<8x128xf32>
    %14 = arith.addf %12, %13 : vector<8x128xf32>
    %15 = math.rsqrt %14 : vector<8x128xf32>
    %16 = arith.mulf %7, %15 : vector<8x128xf32>
    %c0_11 = arith.constant 0 : index
    %c0_12 = arith.constant 0 : index
    %17 = vector.load %arg2[%c0_11, %c0_12] : memref<1x128xf32, #tpu.memory_space<vmem>>, vector<1x128xf32>
    %18 = vector.broadcast %17 : vector<1x128xf32> to vector<8x128xf32>
    %19 = arith.mulf %16, %18 : vector<8x128xf32>
    %c0_13 = arith.constant 0 : index
    %c0_14 = arith.constant 0 : index
    %20 = vector.load %arg3[%c0_13, %c0_14] : memref<1x128xf32, #tpu.memory_space<vmem>>, vector<1x128xf32>
    %21 = vector.broadcast %20 : vector<1x128xf32> to vector<8x128xf32>
    %22 = arith.addf %19, %21 : vector<8x128xf32>
    %c0_15 = arith.constant 0 : index
    %c0_16 = arith.constant 0 : index
    %23 = vector.load %arg6[%c0_15, %c0_16] : memref<8x128xf32, #tpu.memory_space<vmem>>, vector<8x128xf32>
    tpu.vector_store %arg6[%c0_15, %c0_16], %22 {strides = array<i32>} : memref<8x128xf32, #tpu.memory_space<vmem>>, vector<8x128xf32>,
    return
  }
  func.func @transform_0(%arg0: i32) -> (i32, i32) {
    %c0_i32 = arith.constant 0 : i32
    %c0_i32_0 = arith.constant 0 : i32
    return %arg0, %c0_i32 : i32, i32
  }
  func.func @transform_1(%arg0: i32) -> (i32, i32) {
    %c0_i32 = arith.constant 0 : i32
    %c0_i32_0 = arith.constant 0 : i32
    %c0_i32_1 = arith.constant 0 : i32
    return %c0_i32, %c0_i32_0 : i32, i32
  }
  func.func @transform_2(%arg0: i32) -> (i32, i32) {
    %c0_i32 = arith.constant 0 : i32
    %c0_i32_0 = arith.constant 0 : i32
    %c0_i32_1 = arith.constant 0 : i32
    return %c0_i32, %c0_i32_0 : i32, i32
  }
  func.func @transform_3(%arg0: i32) -> (i32, i32) {
    %c0_i32 = arith.constant 0 : i32
    %c0_i32_0 = arith.constant 0 : i32
    %c0_i32_1 = arith.constant 0 : i32
    return %c0_i32, %c0_i32_0 : i32, i32
  }
  func.func @transform_4(%arg0: i32) -> (i32, i32) {
    %c0_i32 = arith.constant 0 : i32
    %c0_i32_0 = arith.constant 0 : i32
    %c0_i32_1 = arith.constant 0 : i32
    return %c0_i32, %c0_i32_0 : i32, i32
  }
  func.func @transform_5(%arg0: i32) -> (i32, i32) {
    %c0_i32 = arith.constant 0 : i32
    %c0_i32_0 = arith.constant 0 : i32
    return %arg0, %c0_i32 : i32, i32
  }
}

</mosaic_0001>

<bundles_post_ra>
// kernel: tpu_custom_call.1
= control target key start
LH: loop header
LB: loop body
LE: loop exit
PB: predicated region body
PF: predicated region fallthrough
CT: control target
= control target key end

     0   :  { %10 = vsyncpa [#allocation3], 0  ;;  %v523_v1 = vmov 0.0   ;;  %vm524_vm0 = vmmov 0   ;;  %vm113_vm1 = vcmask 1043456   ;;  %vm109_vm2 = vcmask 31744   ;;  %s673_s0 = inlined_call_operand.vmem [shape: f32[4,128], index: 0, kind: input, shape index: {}]   ;;  %s674_s1 = inlined_call_operand.vmem [shape: f32[1,128], index: 1, kind: input, shape index: {}]   ;;  %s675_s2 = inlined_call_operand.vmem [shape: f32[1,128], index: 2, kind: input, shape index: {}]   ;;  %s676_s3 = inlined_call_operand.vmem [shape: f32[128,4], index: 3, kind: input, shape index: {}]   ;;  %s677_s4 = inlined_call_operand.vmem [shape: f32[4,128], index: 4, kind: input, shape index: {}]   ;;  %s678_s5 = inlined_call_operand.hbm [shape: f32[4,128], index: 5, kind: output, shape index: {}]  }
   0x1   :  { %v561_v0 = vld [vmem:[%s676_s3 + $0x78] sm:$0xff]  ;;  %414 = vmatprep.subr.mxu0 %v523_v1  ;;  %v567_v2 = vld [vmem:[%s676_s3 + $0x70] sm:$0xff]  ;;  %446 = vmatprep.mubr.msk.f32.mxu0 %vm524_vm0, %v523_v1  ;;  %v35_v3 = vld [vmem:[%s676_s3 + $0x68] sm:$0xff] }
   0x2   :  { %415 = vmatpush3.msra.mxu0 %v561_v0  ;;  %449 = vmatprep.subr.mxu1 %v523_v1  ;;  %v34_v4 = vld [vmem:[%s676_s3 + $0x60] sm:$0xff]  ;;  %v33_v5 = vld [vmem:[%s676_s3 + $0x58] sm:$0xff]  ;;  %v32_v6 = vld [vmem:[%s676_s3 + $0x50] sm:$0xff] }
   0x3   :  { %416 = vmatprep.subr.mxu0 %v523_v1  ;;  %451 = vmatprep.mubr.msk.f32.mxu1 %vm524_vm0, %v523_v1  ;;  %v31_v7 = vld [vmem:[%s676_s3 + $0x48] sm:$0xff]  ;;  %v30_v8 = vld [vmem:[%s676_s3 + $0x40] sm:$0xff]  ;;  %v29_v9 = vld [vmem:[%s676_s3 + $0x38] sm:$0xff] }
   0x4   :  { %417 = vmatpush3.msra.mxu0 %v567_v2  ;;  %v28_v10 = vld [vmem:[%s676_s3 + $0x30] sm:$0xff]  ;;  %v27_v11 = vld [vmem:[%s676_s3 + $0x28] sm:$0xff]  ;;  %v26_v12 = vld [vmem:[%s676_s3 + $0x20] sm:$0xff] }
   0x5   :  { %418 = vmatprep.subr.mxu0 %v523_v1  ;;  %v25_v13 = vld [vmem:[%s676_s3 + $0x18] sm:$0xff]  ;;  %v24_v14 = vld [vmem:[%s676_s3 + $0x10] sm:$0xff]  ;;  %v23_v15 = vld [vmem:[%s676_s3 + $0x8] sm:$0xff] }
   0x6   :  { %419 = vmatpush3.msra.mxu0 %v35_v3  ;;  %v22_v16 = vld [vmem:[%s676_s3] sm:$0xff] }
   0x7   :  { %420 = vmatprep.subr.mxu0 %v523_v1  ;;  %v21_v17 = vld [vmem:[%s673_s0] sm:$0xff] }
   0x8   :  { %421 = vmatpush3.msra.mxu0 %v34_v4  ;;  %v38_v18 = vld [vmem:[%s677_s4] sm:$0xf] }
   0x9   :  { %422 = vmatprep.subr.mxu0 %v523_v1  ;;  %450 = vmatpush3.msk.msra.mxu1 %vm113_vm1, %v38_v18  ;;  %v374_v33 = vld [vmem:[%s674_s1] ss:$0 sm:$0xff] }
   0xa   :  { %423 = vmatpush3.msra.mxu0 %v33_v5  ;;  %454 = vmatprep.subr.mxu1 %v523_v1  ;;  %v375_v35 = vld [vmem:[%s675_s2] ss:$0 sm:$0xff] }
   0xb   :  { %424 = vmatprep.subr.mxu0 %v523_v1 }
   0xc   :  { %425 = vmatpush3.msra.mxu0 %v32_v6 }
   0xd   :  { %426 = vmatprep.subr.mxu0 %v523_v1 }
   0xe   :  { %427 = vmatpush3.msra.mxu0 %v31_v7 }
   0xf   :  { %428 = vmatprep.subr.mxu0 %v523_v1 }
  0x10   :  { %429 = vmatpush3.msra.mxu0 %v30_v8 }
  0x11   :  { %430 = vmatprep.subr.mxu0 %v523_v1 }
  0x12   :  { %431 = vmatpush3.msra.mxu0 %v29_v9 }
  0x13   :  { %432 = vmatprep.subr.mxu0 %v523_v1 }
  0x14   :  { %433 = vmatpush3.msra.mxu0 %v28_v10 }
  0x15   :  { %434 = vmatprep.subr.mxu0 %v523_v1 }
  0x16   :  { %435 = vmatpush3.msra.mxu0 %v27_v11 }
  0x17   :  { %436 = vmatprep.subr.mxu0 %v523_v1 }
  0x18   :  { %437 = vmatpush3.msra.mxu0 %v26_v12 }
  0x19   :  { %438 = vmatprep.subr.mxu0 %v523_v1 }
  0x1a   :  { %439 = vmatpush3.msra.mxu0 %v25_v13 }
  0x1b   :  { %440 = vmatprep.subr.mxu0 %v523_v1 }
  0x1c   :  { %441 = vmatpush3.msra.mxu0 %v24_v14 }
  0x1d   :  { %442 = vmatprep.subr.mxu0 %v523_v1 }
  0x1e   :  { %443 = vmatpush3.msra.mxu0 %v23_v15 }
  0x1f   :  { %444 = vmatprep.subr.mxu0 %v523_v1 }
  0x20   :  { %445 = vmatpush3.msra.mxu0 %v22_v16 }
  0x21   :  { %447 = vmatmul.mubr.f32.vlgmr.msra.gmra.mxu0 %v21_v17  ;;  %489 = vmatprep.subr.mxu0 %v523_v1 }
  0x22   :  { %491 = vmatprep.mubr.msk.f32.mxu0 %vm524_vm0, %v523_v1  ;;  %490 = vmatpush3.msk.msra.mxu0 %vm113_vm1, %v38_v18 }
  0xe1   :  { %v105_v19 = vpop.f32.mrf.mxu0 }
  0xe2   :  { %452 = vmatmul.mubr.msk.f32.vlgmr.msra.gmra.mxu1 %vm109_vm2, %v105_v19 }
  0xe3   :  { %v448_v20 = vpop.f32.mrf.mxu0  ;;  %455 = vmatpush3.msra.mxu1 %v561_v0  ;;  %486 = vmatprep.mubr.msk.f32.mxu1 %vm524_vm0, %v523_v1 }
  0xe4   :  { %456 = vmatprep.subr.mxu1 %v523_v1 }
  0xe5   :  { %457 = vmatpush3.msra.mxu1 %v567_v2 }
  0xe6   :  { %458 = vmatprep.subr.mxu1 %v523_v1 }
  0xe7   :  { %459 = vmatpush3.msra.mxu1 %v35_v3 }
  0xe8   :  { %460 = vmatprep.subr.mxu1 %v523_v1 }
  0xe9   :  { %461 = vmatpush3.msra.mxu1 %v34_v4 }
  0xea   :  { %462 = vmatprep.subr.mxu1 %v523_v1 }
  0xeb   :  { %463 = vmatpush3.msra.mxu1 %v33_v5 }
  0xec   :  { %464 = vmatprep.subr.mxu1 %v523_v1 }
  0xed   :  { %465 = vmatpush3.msra.mxu1 %v32_v6 }
  0xee   :  { %466 = vmatprep.subr.mxu1 %v523_v1 }
  0xef   :  { %467 = vmatpush3.msra.mxu1 %v31_v7 }
  0xf0   :  { %468 = vmatprep.subr.mxu1 %v523_v1 }
  0xf1   :  { %469 = vmatpush3.msra.mxu1 %v30_v8 }
  0xf2   :  { %470 = vmatprep.subr.mxu1 %v523_v1 }
  0xf3   :  { %471 = vmatpush3.msra.mxu1 %v29_v9 }
  0xf4   :  { %472 = vmatprep.subr.mxu1 %v523_v1 }
  0xf5   :  { %473 = vmatpush3.msra.mxu1 %v28_v10 }
  0xf6   :  { %474 = vmatprep.subr.mxu1 %v523_v1 }
  0xf7   :  { %475 = vmatpush3.msra.mxu1 %v27_v11 }
  0xf8   :  { %476 = vmatprep.subr.mxu1 %v523_v1 }
  0xf9   :  { %477 = vmatpush3.msra.mxu1 %v26_v12 }
  0xfa   :  { %478 = vmatprep.subr.mxu1 %v523_v1 }
  0xfb   :  { %479 = vmatpush3.msra.mxu1 %v25_v13 }
  0xfc   :  { %480 = vmatprep.subr.mxu1 %v523_v1 }
  0xfd   :  { %481 = vmatpush3.msra.mxu1 %v24_v14 }
  0xfe   :  { %482 = vmatprep.subr.mxu1 %v523_v1 }
  0xff   :  { %483 = vmatpush3.msra.mxu1 %v23_v15 }
 0x100   :  { %484 = vmatprep.subr.mxu1 %v523_v1 }
 0x101   :  { %485 = vmatpush3.msra.mxu1 %v22_v16 }
 0x1a2   :  { %v183_v21 = vpop.f32.mrf.mxu1 }
 0x1a3   :  { %v187_v22 = vmul.f32 0.03125, %v183_v21 }
 0x1a4   :  { %v453_v23 = vpop.f32.mrf.mxu1 }
 0x1a5   :  { %v188_v24 = vsub.f32 %v21_v17, %v187_v22 }
 0x1a7   :  { %v189_v25 = vmul.f32 %v188_v24, %v188_v24 }
 0x1a9   :  { %487 = vmatmul.mubr.f32.vlgmr.msra.gmra.mxu1 %v189_v25 }
 0x269   :  { %v256_v26 = vpop.f32.mrf.mxu1 }
 0x26a   :  { %492 = vmatmul.mubr.msk.f32.vlgmr.msra.gmra.mxu0 %vm109_vm2, %v256_v26 }
 0x26b   :  { %v488_v27 = vpop.f32.mrf.mxu1 }
 0x32a   :  { %v329_v28 = vpop.f32.mrf.mxu0 }
 0x32b   :  { %v333_v29 = vmul.f32 0.03125, %v329_v28 }
 0x32c   :  { %v493_v30 = vpop.f32.mrf.mxu0 }
 0x32d   :  { %v334_v31 = vadd.f32 1e-05, %v333_v29 }
 0x32f   :  { %499 = vrsqrt.f32 %v334_v31 }
 0x33c   :  { %v500_v32 = vpop.eup %499 }
 0x33d   :  { %v336_v34 = vmul.f32 %v500_v32, %v188_v24 }
 0x33f   :  { %v344_v36 = vmul.f32 %v374_v33, %v336_v34 }
 0x341   :  { %v352_v37 = vadd.f32 %v375_v35, %v344_v36 }
 0x343   :  { %353 = vst [vmem:[#allocation2] sm:$0xff] %v352_v37 }
 0x344   :  { %358 = vsyncadd [#allocation3], 64  ;;  %s525_s30 = smov [#allocation2]  }
 0x345   :  { %s359_s6 = sshll.u32 %s525_s30, 4  ;;  %s360_s6 = int_to_ptr.vmem [resolvable:$true] %s359_s6 }
 0x346   :  { %s501_s7 = scalar_lea.vmem %s360_s6, 64  ;;  %s505_s8 = scalar_lea.vmem %s360_s6, 128 }
 0x347   :  { %p502_p0 = scmp.ne.s32.totalorder %s360_s6, %s501_s7  ;;  %p506_p1 = scmp.lt.s32.totalorder %s360_s6, %s360_s6 }
 0x348   :  { %p507_p2 = scmp.lt.s32.totalorder %s505_s8, %s501_s7 }
 0x34a   :  { %p508_p3 = por %p507_p2, %p506_p1 }
 0x34c   :  { %p509_p4 = pnand %p508_p3, %p502_p0 }
 0x34e   :  { %512 = shalt.err (!%p509_p4)
}
 0x34f   :  { %s526_s1 = smov 64   ;;  %s527_s9 = smov 4  }
 0x350   :  { %365 = dma.vmem_to_hbm [thread:$0]  %s360_s6, 64, %s678_s5, [#allocation3], %s526_s1, %s526_s1, %s527_s9  }
 0x351   :  { %521 = dma.done.wait [#allocation3], 128  }
 0x352   :  { %522 = vsyncadd [#allocation3], 4294967168 }
 0x353   :  { %369 = vsyncpa [#allocation3], 1 }

</bundles_post_ra>
